<compile_context>
chip_gen: v6e
topology: v6e:2x2x1
jax: 0.10.0
libtpu: 0.0.40
codegen_flags: <defaults>
</compile_context>

<pallas_src>
import functools

import jax
import jax.numpy as jnp
from jax import lax
from jax.experimental import pallas as pl
from jax.experimental.pallas import tpu as pltpu


def _round_up(x, m):
    return ((x + m - 1) // m) * m


def _ce_kernel(preds_ref, gts_ref, out_ref, *, n_rows, tile_n, eps):
    # preds_ref: (TN, C) logits tile, gts_ref: (TN, 1) int32 labels tile,
    # out_ref:   (8, 128) f32 tile; the tile's partial loss sum goes to [0, 0].
    i = pl.program_id(0)

    logits = preds_ref[...].astype(jnp.float32)                   # (TN, C)
    gt = gts_ref[...]                                              # (TN, 1)
    tn, c = logits.shape

    # Numerically stable log-softmax pieces along the class (lane) axis,
    # WITHOUT materializing the full (TN, C) logp tile.
    m = jnp.max(logits, axis=1, keepdims=True)                     # (TN, 1)
    z = logits - m                                                 # (TN, C)
    lse = jnp.log(jnp.sum(jnp.exp(z), axis=1, keepdims=True))      # (TN, 1)

    # z at the target class via a lane-wise compare/select (no scatter).
    col = lax.broadcasted_iota(jnp.int32, (tn, c), 1)
    z_gt = jnp.sum(jnp.where(col == gt, z, 0.0), axis=1, keepdims=True)  # (TN, 1)
    logp_gt = z_gt - lse                                           # (TN, 1)

    w_other = (eps / (c - 1)) if c > 1 else 0.0
    w_gt = 1.0 - eps
    if w_other != 0.0:
        # sum_j logp_j = sum_j z_j - C * lse
        sum_z = jnp.sum(z, axis=1, keepdims=True)                  # (TN, 1)
        sum_logp = sum_z - float(c) * lse
        row_loss = -((w_gt - w_other) * logp_gt + w_other * sum_logp)
    else:
        row_loss = -(w_gt * logp_gt)

    # Mask rows past the true N BEFORE the tile reduction (ragged last tile:
    # padded rows may carry garbage through exp/log but stay row-local).
    row_ids = i * tile_n + lax.broadcasted_iota(jnp.int32, (tn, 1), 0)
    row_loss = jnp.where(row_ids < n_rows, row_loss, 0.0)
    tile_sum = jnp.sum(row_loss)                                   # scalar

    # One aligned, unmasked (8, 128) store per step: partial sum at [0, 0],
    # zeros elsewhere (they do not affect the wrapper-side sum).
    rr = lax.broadcasted_iota(jnp.int32, (8, 128), 0)
    cc = lax.broadcasted_iota(jnp.int32, (8, 128), 1)
    out_ref[...] = jnp.where((rr == 0) & (cc == 0), tile_sum, 0.0)


def cross_entropy_loss(preds, gts, smoothing=True, tile_n=None):
    """Matches CrossEntropyLoss(smoothing).forward(preds, gts); returns f32 scalar."""
    preds = jnp.asarray(preds)
    gts = jnp.asarray(gts).reshape(-1, 1).astype(jnp.int32)        # gts.view(-1)
    n, c = preds.shape
    eps = 0.2 if smoothing else 0.0

    itemsize = preds.dtype.itemsize
    mult = 16 if itemsize < 4 else 8      # bf16 packs 16 sublanes per vreg

    if tile_n is None:
        # HBM-bound: target ~4 MiB logits blocks (cap 2048 rows). Small inputs
        # collapse to a single whole-array block via the min() below.
        target_bytes = 4 << 20
        tile_n = max(mult, min(2048, target_bytes // max(1, c * itemsize)))
    tn = min(_round_up(int(tile_n), mult), _round_up(n, mult))
    num_tiles = pl.cdiv(n, tn)

    kernel = functools.partial(_ce_kernel, n_rows=n, tile_n=tn, eps=eps)

    # VMEM budget: double-buffered logits+labels blocks plus output/slack;
    # floor 32 MiB (helps v5e's 16 MiB scoped default), cap 48 MiB so v7x's
    # 64 MiB physical VMEM keeps headroom.
    block_bytes = tn * c * itemsize + tn * 4
    vmem_limit = int(min(48 << 20, max(32 << 20, 4 * block_bytes + (4 << 20))))

    cost = pl.CostEstimate(
        flops=5 * n * c,
        transcendentals=n * c + n,                       # exp per elem + log per row
        bytes_accessed=n * c * itemsize + n * 4 + num_tiles * 8 * 128 * 4,
    )

    partials = pl.pallas_call(
        kernel,
        out_shape=jax.ShapeDtypeStruct((num_tiles * 8, 128), jnp.float32),
        grid_spec=pltpu.PrefetchScalarGridSpec(
            num_scalar_prefetch=0,
            grid=(num_tiles,),
            in_specs=[
                pl.BlockSpec((tn, c), lambda i: (i, 0)),   # logits row-tile
                pl.BlockSpec((tn, 1), lambda i: (i, 0)),   # labels row-tile
            ],
            out_specs=pl.BlockSpec((8, 128), lambda i: (i, 0)),
        ),
        compiler_params=pltpu.CompilerParams(
            dimension_semantics=("parallel",),             # independent row tiles
            vmem_limit_bytes=vmem_limit,
        ),
        cost_estimate=cost,
    )(preds, gts)

    # Each tile wrote its partial sum at [0, 0] of its block; zeros elsewhere.
    return jnp.sum(partials) / n


def _ce_ref(preds, gts, smoothing=True):
    # Pure-JAX reference of the PyTorch forward.
    preds = preds.astype(jnp.float32)
    n_class = preds.shape[1]
    logp = jax.nn.log_softmax(preds, axis=1)
    if smoothing:
        eps = 0.2
        one_hot = jax.nn.one_hot(gts, n_class, dtype=jnp.float32)
        one_hot = one_hot * (1.0 - eps) + (1.0 - one_hot) * eps / (n_class - 1)
        return -jnp.mean(jnp.sum(one_hot * logp, axis=1))
    picked = jnp.take_along_axis(logp, gts.reshape(-1, 1), axis=1)
    return -jnp.mean(picked)


if __name__ == "__main__":
    key = jax.random.PRNGKey(0)
    k1, k2 = jax.random.split(key)

    # N not a multiple of the tile exercises the masked ragged last tile.
    N, C = 70, 40
    preds = jax.random.normal(k1, (N, C), dtype=jnp.float32) * 3.0
    gts = jax.random.randint(k2, (N,), 0, C, dtype=jnp.int32)

    # Default tiling (single whole-array block) and a forced small tile
    # (multiple grid steps + masked ragged tail), both smoothing modes.
    for tile in (None, 32):
        for smoothing in (True, False):
            got = jax.block_until_ready(
                cross_entropy_loss(preds, gts, smoothing=smoothing, tile_n=tile))
            want = jax.block_until_ready(_ce_ref(preds, gts, smoothing=smoothing))
            assert jnp.allclose(got, want, rtol=1e-5, atol=1e-5), (
                tile, smoothing, got, want)

    # bf16 logits feed (halved HBM bytes; in-kernel compute stays f32).
    preds_bf16 = preds.astype(jnp.bfloat16)
    got = jax.block_until_ready(cross_entropy_loss(preds_bf16, gts, smoothing=True))
    want = jax.block_until_ready(_ce_ref(preds_bf16, gts, smoothing=True))
    assert jnp.allclose(got, want, rtol=1e-4, atol=1e-4), (got, want)

    print("KERNEL_OK")
</pallas_src>

<mosaic_0001>
module attributes {stable_mosaic.version = 11 : i64} {
  func.func @_ce_kernel(%arg0: i32, %arg1: memref<72x40xf32, #tpu.memory_space<vmem>>, %arg2: memref<72x1xi32, #tpu.memory_space<vmem>>, %arg3: memref<8x128xf32, #tpu.memory_space<vmem>>) attributes {dimension_semantics = [#tpu.dimension_semantics<parallel>], iteration_bounds = array<i64: 1>, scalar_prefetch = 0 : i64, scratch_operands = 0 : i64, tpu.core_type = #tpu.core_type<tc>, window_params = [{transform_indices = @transform_0, window_bounds = array<i64: 72, 40>}, {transform_indices = @transform_1, window_bounds = array<i64: 72, 1>}, {transform_indices = @transform_2, window_bounds = array<i64: 8, 128>}]} {
    %c0 = arith.constant 0 : index
    %c0_0 = arith.constant 0 : index
    %0 = vector.load %arg1[%c0, %c0_0] : memref<72x40xf32, #tpu.memory_space<vmem>>, vector<72x40xf32>
    %c0_1 = arith.constant 0 : index
    %c0_2 = arith.constant 0 : index
    %1 = vector.load %arg2[%c0_1, %c0_2] : memref<72x1xi32, #tpu.memory_space<vmem>>, vector<72x1xi32>
    %cst = arith.constant dense<0xFF800000> : vector<72xf32>
    %2 = vector.multi_reduction <maximumf>, %0, %cst [1] : vector<72x40xf32> to vector<72xf32>
    %3 = vector.shape_cast %2 : vector<72xf32> to vector<72x1xf32>
    %4 = vector.broadcast %3 : vector<72x1xf32> to vector<72x40xf32>
    %5 = arith.subf %0, %4 : vector<72x40xf32>
    %6 = math.exp %5 : vector<72x40xf32>
    %cst_3 = arith.constant dense<0.000000e+00> : vector<72xf32>
    %7 = vector.multi_reduction <add>, %6, %cst_3 [1] : vector<72x40xf32> to vector<72xf32>
    %8 = vector.shape_cast %7 : vector<72xf32> to vector<72x1xf32>
    %9 = math.log %8 : vector<72x1xf32>
    %10 = tpu.iota {dimensions = array<i32: 1>} : vector<72x40xi32>
    %11 = vector.broadcast %1 : vector<72x1xi32> to vector<72x40xi32>
    %12 = arith.cmpi eq, %10, %11 : vector<72x40xi32>
    %cst_4 = arith.constant 0.000000e+00 : f32
    %13 = vector.broadcast %cst_4 : f32 to vector<72x40xf32>
    %14 = arith.select %12, %5, %13 : vector<72x40xi1>, vector<72x40xf32>
    %cst_5 = arith.constant dense<0.000000e+00> : vector<72xf32>
    %15 = vector.multi_reduction <add>, %14, %cst_5 [1] : vector<72x40xf32> to vector<72xf32>
    %16 = vector.shape_cast %15 : vector<72xf32> to vector<72x1xf32>
    %17 = arith.subf %16, %9 : vector<72x1xf32>
    %cst_6 = arith.constant dense<0.000000e+00> : vector<72xf32>
    %18 = vector.multi_reduction <add>, %5, %cst_6 [1] : vector<72x40xf32> to vector<72xf32>
    %19 = vector.shape_cast %18 : vector<72xf32> to vector<72x1xf32>
    %cst_7 = arith.constant 4.000000e+01 : f32
    %20 = vector.broadcast %cst_7 : f32 to vector<72x1xf32>
    %21 = arith.mulf %20, %9 : vector<72x1xf32>
    %22 = arith.subf %19, %21 : vector<72x1xf32>
    %cst_8 = arith.constant 0.794871807 : f32
    %23 = vector.broadcast %cst_8 : f32 to vector<72x1xf32>
    %24 = arith.mulf %23, %17 : vector<72x1xf32>
    %cst_9 = arith.constant 0.00512820529 : f32
    %25 = vector.broadcast %cst_9 : f32 to vector<72x1xf32>
    %26 = arith.mulf %25, %22 : vector<72x1xf32>
    %27 = arith.addf %24, %26 : vector<72x1xf32>
    %cst_10 = arith.constant 0.000000e+00 : f32
    %28 = vector.broadcast %cst_10 : f32 to vector<72x1xf32>
    %29 = arith.subf %28, %27 : vector<72x1xf32>
    %c72_i32 = arith.constant 72 : i32
    %30 = arith.muli %arg0, %c72_i32 : i32
    %31 = tpu.iota {dimensions = array<i32: 0>} : vector<72x1xi32>
    %32 = vector.broadcast %30 : i32 to vector<72x1xi32>
    %33 = arith.addi %32, %31 : vector<72x1xi32>
    %c70_i32 = arith.constant 70 : i32
    %34 = vector.broadcast %c70_i32 : i32 to vector<72x1xi32>
    %35 = arith.cmpi slt, %33, %34 : vector<72x1xi32>
    %cst_11 = arith.constant 0.000000e+00 : f32
    %36 = vector.broadcast %cst_11 : f32 to vector<72x1xf32>
    %37 = arith.select %35, %29, %36 : vector<72x1xi1>, vector<72x1xf32>
    %38 = vector.shape_cast %37 : vector<72x1xf32> to vector<1x72x1xf32>
    %cst_12 = arith.constant dense<0.000000e+00> : vector<1xf32>
    %39 = vector.multi_reduction <add>, %38, %cst_12 [1, 2] : vector<1x72x1xf32> to vector<1xf32>
    %40 = vector.shape_cast %39 : vector<1xf32> to vector<1x1x1xf32>
    %41 = vector.extract %40[0, 0, 0] : f32 from vector<1x1x1xf32>
    %42 = tpu.iota {dimensions = array<i32: 0>} : vector<8x128xi32>
    %43 = tpu.iota {dimensions = array<i32: 1>} : vector<8x128xi32>
    %c0_i32 = arith.constant 0 : i32
    %44 = vector.broadcast %c0_i32 : i32 to vector<8x128xi32>
    %45 = arith.cmpi eq, %42, %44 : vector<8x128xi32>
    %c0_i32_13 = arith.constant 0 : i32
    %46 = vector.broadcast %c0_i32_13 : i32 to vector<8x128xi32>
    %47 = arith.cmpi eq, %43, %46 : vector<8x128xi32>
    %48 = arith.andi %45, %47 : vector<8x128xi1>
    %cst_14 = arith.constant 0.000000e+00 : f32
    %49 = vector.broadcast %41 : f32 to vector<8x128xf32>
    %50 = vector.broadcast %cst_14 : f32 to vector<8x128xf32>
    %51 = arith.select %48, %49, %50 : vector<8x128xi1>, vector<8x128xf32>
    %c0_15 = arith.constant 0 : index
    %c0_16 = arith.constant 0 : index
    %52 = vector.load %arg3[%c0_15, %c0_16] : memref<8x128xf32, #tpu.memory_space<vmem>>, vector<8x128xf32>
    tpu.vector_store %arg3[%c0_15, %c0_16], %51 {strides = array<i32>} : memref<8x128xf32, #tpu.memory_space<vmem>>, vector<8x128xf32>,
    return
  }
  func.func @transform_0(%arg0: i32) -> (i32, i32) {
    %c0_i32 = arith.constant 0 : i32
    %c0_i32_0 = arith.constant 0 : i32
    return %arg0, %c0_i32 : i32, i32
  }
  func.func @transform_1(%arg0: i32) -> (i32, i32) {
    %c0_i32 = arith.constant 0 : i32
    %c0_i32_0 = arith.constant 0 : i32
    return %arg0, %c0_i32 : i32, i32
  }
  func.func @transform_2(%arg0: i32) -> (i32, i32) {
    %c0_i32 = arith.constant 0 : i32
    %c0_i32_0 = arith.constant 0 : i32
    return %arg0, %c0_i32 : i32, i32
  }
}

</mosaic_0001>

<bundles_post_ra>
// kernel: tpu_custom_call.1
= control target key start
LH: loop header
LB: loop body
LE: loop exit
PB: predicated region body
PF: predicated region fallthrough
CT: control target
= control target key end

     0   :  { %vm30_vm0 = vcmask 326656   ;;  %v444_v6 = vmov 0   ;;  %s617_s0 = inlined_call_operand.vmem [shape: f32[70,40], index: 0, kind: input, shape index: {}]   ;;  %s618_s1 = inlined_call_operand.vmem [shape: s32[70,1], index: 1, kind: input, shape index: {}]   ;;  %s619_s2 = inlined_call_operand.hbm [shape: f32[8,128], index: 2, kind: output, shape index: {}]  }
   0x1   :  { %v14_v0 = vld [vmem:[%s617_s0 + $0x10] sm:$0xff]  ;;  %v12_v1 = vld [vmem:[%s617_s0] sm:$0xff]  ;;  %v15_v2 = vld [vmem:[%s617_s0 + $0x18] sm:$0xff]  ;;  %384 = vset.pattern.permute.xlu1 %v444_v6  ;;  %385 = vset.pattern.permute.xlu0 %v444_v6 }
   0x2   :  { %v37_v3 = vsel %vm30_vm0, %v14_v0, -inf  ;;  %v31_v4 = vsel %vm30_vm0, %v12_v1, -inf  ;;  %v13_v5 = vld [vmem:[%s617_s0 + $0x8] sm:$0xff]  ;;  %v40_v7 = vsel %vm30_vm0, %v15_v2, -inf  ;;  %v16_v10 = vld [vmem:[%s617_s0 + $0x20] sm:$0xff] }
   0x3   :  { %38 = vmax.xlane.f32.xlu1 %v37_v3  ;;  %32 = vmax.xlane.f32.xlu0 %v31_v4  ;;  %v34_v8 = vsel %vm30_vm0, %v13_v5, -inf  ;;  %v17_v9 = vld [vmem:[%s617_s0 + $0x28] sm:$0xff] }
   0x7   :  { %41 = vmax.xlane.f32.xlu1 %v40_v7  ;;  %35 = vmax.xlane.f32.xlu0 %v34_v8 }
   0x8   :  { %7 = vsyncpa [#allocation3], 0  ;;  %v46_v11 = vsel %vm30_vm0, %v17_v9, -inf  ;;  %v43_v12 = vsel %vm30_vm0, %v16_v10, -inf  ;;  %v488_v13 = vld [vmem:[%s617_s0 + $0x38] sm:$0xff]  ;;  %v493_v14 = vld [vmem:[%s617_s0 + $0x30] sm:$0xff]  ;;  %v130_v39 = vlaneseq }
   0x9   :  { %v52_v15 = vsel %vm30_vm0, %v488_v13, -inf  ;;  %v49_v16 = vsel %vm30_vm0, %v493_v14, -inf  ;;  %v502_v17 = vld [vmem:[%s617_s0 + $0x40] sm:$0xff]  ;;  %v23_v20 = vld [vmem:[%s618_s1 + $0x10] sm:$0xff]  ;;  %v24_v21 = vld [vmem:[%s618_s1 + $0x18] sm:$0xff]  ;;  %vm333_vm10 = vcmask 7168  }
   0xa   :  { %v55_v18 = vsel %vm30_vm0, %v502_v17, -inf  ;;  %v21_v19 = vld [vmem:[%s618_s1] sm:$0xff]  ;;  %v22_v22 = vld [vmem:[%s618_s1 + $0x8] sm:$0xff]  ;;  %v27_v25 = vld [vmem:[%s618_s1 + $0x30] sm:$0xff]  ;;  %v537_v45 = vand.u32 127, %v130_v39 }
   0xb   :  { %47 = vmax.xlane.f32.xlu1 %v46_v11  ;;  %44 = vmax.xlane.f32.xlu0 %v43_v12  ;;  %v25_v23 = vld [vmem:[%s618_s1 + $0x20] sm:$0xff]  ;;  %v26_v24 = vld [vmem:[%s618_s1 + $0x28] sm:$0xff]  ;;  %v28_v26 = vld [vmem:[%s618_s1 + $0x38] sm:$0xff] }
   0xc   :  { %v29_v27 = vld [vmem:[%s618_s1 + $0x40] sm:$0xff]  ;;  %vm361_vm13 = vcmp.eq.s32.totalorder %v537_v45, 0  ;;  %s445_s1 = smov [#allocation2]  }
   0xd   :  { %s372_s16 = sshll.u32 %s445_s1, 4  ;;  %s373_s16 = int_to_ptr.vmem [resolvable:$true] %s372_s16 }
   0xe   :  { %s422_s18 = scalar_lea.vmem %s373_s16, 128  ;;  %p427_p1 = scmp.lt.s32.totalorder %s373_s16, %s373_s16 }
   0xf   :  { %53 = vmax.xlane.f32.xlu1 %v52_v15  ;;  %50 = vmax.xlane.f32.xlu0 %v49_v16  ;;  %p423_p0 = scmp.ne.s32.totalorder %s373_s16, %s422_s18  ;;  %p428_p2 = scmp.lt.s32.totalorder %s422_s18, %s422_s18 }
  0x11   :  { %p429_p3 = por %p428_p2, %p427_p1 }
  0x13   :  { %56 = vmax.xlane.f32.xlu0 %v55_v18  ;;  %p430_p4 = pnand %p429_p3, %p423_p0 }
  0x20   :  { %133 = vperm.xlu1 %384, %v21_v19  }
  0x24   :  { %139 = vperm.xlu1 %384, %v23_v20  }
  0x28   :  { %142 = vperm.xlu1 %384, %v24_v21  }
  0x29   :  { %136 = vperm.xlu0 %385, %v22_v22  }
  0x2c   :  { %145 = vperm.xlu1 %384, %v25_v23  }
  0x30   :  { %148 = vperm.xlu1 %384, %v26_v24  }
  0x34   :  { %151 = vperm.xlu1 %384, %v27_v25  }
  0x38   :  { %154 = vperm.xlu1 %384, %v28_v26  }
  0x3c   :  { %157 = vperm.xlu1 %384, %v29_v27  }
  0x8c   :  { %v39_v28 = vpop.xlane.xlu1 %38  ;;  %v33_v29 = vpop.xlane.xlu0 %32 }
  0x8d   :  { %v58_v30 = vsub.f32 %v12_v1, %v33_v29  ;;  %v60_v35 = vsub.f32 %v14_v0, %v39_v28 }
  0x8f   :  { %v213_v31 = vsel %vm30_vm0, %v58_v30, 0.0  ;;  %v67_v40 = vmul.f32 1.442695, %v58_v30  ;;  %v219_v43 = vsel %vm30_vm0, %v60_v35, 0.0  ;;  %v71_v46 = vmul.f32 1.442695, %v60_v35 }
  0x90   :  { %v42_v32 = vpop.xlane.xlu1 %41  ;;  %214 = vadd.xlane.f32.xlu1 %v213_v31  ;;  %v36_v33 = vpop.xlane.xlu0 %35 }
  0x91   :  { %v59_v34 = vsub.f32 %v13_v5, %v36_v33  ;;  %v61_v41 = vsub.f32 %v15_v2, %v42_v32  ;;  %386 = vpow2.f32 %v67_v40 }
  0x93   :  { %v216_v36 = vsel %vm30_vm0, %v59_v34, 0.0  ;;  %v69_v42 = vmul.f32 1.442695, %v59_v34  ;;  %v73_v49 = vmul.f32 1.442695, %v61_v41  ;;  %v222_v51 = vsel %vm30_vm0, %v61_v41, 0.0 }
  0x94   :  { %v48_v37 = vpop.xlane.xlu1 %47  ;;  %217 = vadd.xlane.f32.xlu0 %v216_v36  ;;  %v45_v38 = vpop.xlane.xlu0 %44 }
  0x95   :  { %v539_v47 = vsub.f32 %v17_v9, %v48_v37  ;;  %388 = vpow2.f32 %v69_v42  ;;  %v541_v50 = vsub.f32 %v16_v10, %v45_v38 }
  0x96   :  { %390 = vpow2.f32 %v71_v46 }
  0x97   :  { %v77_v53 = vmul.f32 1.442695, %v539_v47  ;;  %392 = vpow2.f32 %v73_v49  ;;  %v75_v56 = vmul.f32 1.442695, %v541_v50  ;;  %v228_v40 = vsel %vm30_vm0, %v539_v47, 0.0 }
  0x98   :  { %v54_v44 = vpop.xlane.xlu1 %53  ;;  %220 = vadd.xlane.f32.xlu0 %v219_v43  ;;  %v51_v48 = vpop.xlane.xlu0 %50 }
  0x99   :  { %v547_v54 = vsub.f32 %v488_v13, %v54_v44  ;;  %v551_v57 = vsub.f32 %v493_v14, %v51_v48  ;;  %394 = vpow2.f32 %v77_v53 }
  0x9a   :  { %396 = vpow2.f32 %v75_v56 }
  0x9b   :  { %v81_v61 = vmul.f32 1.442695, %v547_v54  ;;  %v79_v63 = vmul.f32 1.442695, %v551_v57  ;;  %v231_v43 = vsel %vm30_vm0, %v551_v57, 0.0 }
  0x9c   :  { %v134_v52 = vpop.permute.xlu1 %133  ;;  %223 = vadd.xlane.f32.xlu0 %v222_v51  ;;  %v57_v59 = vpop.xlane.xlu0 %56 }
  0x9d   :  { %vm159_vm1 = vcmp.eq.s32.totalorder %v537_v45, %v134_v52  ;;  %v558_v0 = vsub.f32 %v502_v17, %v57_v59  ;;  %398 = vpow2.f32 %v81_v61 }
  0x9e   :  { %v168_v55 = vsel %vm159_vm1, %v58_v30, 0.0  ;;  %v387_v6 = vpop.eup %386  ;;  %400 = vpow2.f32 %v79_v63 }
  0x9f   :  { %v177_v58 = vsel %vm30_vm0, %v168_v55, 0.0  ;;  %v83_v7 = vmul.f32 1.442695, %v558_v0  ;;  %v85_v13 = vsel %vm30_vm0, %v387_v6, 0.0  ;;  %v237_v48 = vsel %vm30_vm0, %v558_v0, 0.0 }
  0xa0   :  { %v140_v60 = vpop.permute.xlu1 %139  ;;  %178 = vadd.xlane.f32.xlu1 %v177_v58 }
  0xa1   :  { %vm161_vm2 = vcmp.eq.s32.totalorder %v537_v45, %v140_v60  ;;  %402 = vpow2.f32 %v83_v7 }
  0xa2   :  { %v170_v62 = vsel %vm161_vm2, %v60_v35, 0.0  ;;  %v389_v10 = vpop.eup %388  ;;  %v225_v35 = vsel %vm30_vm0, %v541_v50, 0.0 }
  0xa3   :  { %v183_v1 = vsel %vm30_vm0, %v170_v62, 0.0  ;;  %v391_v12 = vpop.eup %390  ;;  %v88_v14 = vsel %vm30_vm0, %v389_v10, 0.0 }
  0xa4   :  { %v143_v2 = vpop.permute.xlu1 %142  ;;  %184 = vadd.xlane.f32.xlu1 %v183_v1  ;;  %v137_v3 = vpop.permute.xlu0 %136  ;;  %v91_v18 = vsel %vm30_vm0, %v391_v12, 0.0 }
  0xa5   :  { %vm162_vm3 = vcmp.eq.s32.totalorder %v537_v45, %v143_v2  ;;  %vm160_vm4 = vcmp.eq.s32.totalorder %v537_v45, %v137_v3  ;;  %v393_v15 = vpop.eup %392 }
  0xa6   :  { %v171_v4 = vsel %vm162_vm3, %v61_v41, 0.0  ;;  %v169_v5 = vsel %vm160_vm4, %v59_v34, 0.0  ;;  %v395_v16 = vpop.eup %394  ;;  %v94_v17 = vsel %vm30_vm0, %v393_v15, 0.0 }
  0xa7   :  { %v186_v8 = vsel %vm30_vm0, %v171_v4, 0.0  ;;  %v180_v9 = vsel %vm30_vm0, %v169_v5, 0.0  ;;  %v397_v19 = vpop.eup %396  ;;  %v100_v22 = vsel %vm30_vm0, %v395_v16, 0.0 }
  0xa8   :  { %187 = vadd.xlane.f32.xlu1 %v186_v8  ;;  %181 = vadd.xlane.f32.xlu0 %v180_v9  ;;  %v146_v11 = vpop.permute.xlu1 %145  ;;  %v97_v23 = vsel %vm30_vm0, %v397_v19, 0.0 }
  0xa9   :  { %vm163_vm5 = vcmp.eq.s32.totalorder %v537_v45, %v146_v11 }
  0xaa   :  { %v399_v21 = vpop.eup %398  ;;  %v172_v29 = vsel %vm163_vm5, %v541_v50, 0.0 }
  0xab   :  { %v401_v24 = vpop.eup %400  ;;  %v106_v26 = vsel %vm30_vm0, %v399_v21, 0.0  ;;  %v189_v30 = vsel %vm30_vm0, %v172_v29, 0.0 }
  0xac   :  { %86 = vadd.xlane.f32.xlu1 %v85_v13  ;;  %89 = vadd.xlane.f32.xlu0 %v88_v14  ;;  %v149_v20 = vpop.permute.xlu1 %148  ;;  %v103_v27 = vsel %vm30_vm0, %v401_v24, 0.0 }
  0xad   :  { %vm164_vm6 = vcmp.eq.s32.totalorder %v537_v45, %v149_v20 }
  0xae   :  { %v403_v28 = vpop.eup %402  ;;  %v173_v33 = vsel %vm164_vm6, %v539_v47, 0.0  ;;  %v234_v47 = vsel %vm30_vm0, %v547_v54, 0.0 }
  0xaf   :  { %v109_v31 = vsel %vm30_vm0, %v403_v28, 0.0  ;;  %v192_v34 = vsel %vm30_vm0, %v173_v33, 0.0 }
  0xb0   :  { %95 = vadd.xlane.f32.xlu1 %v94_v17  ;;  %92 = vadd.xlane.f32.xlu0 %v91_v18  ;;  %v152_v25 = vpop.permute.xlu1 %151 }
  0xb1   :  { %vm165_vm7 = vcmp.eq.s32.totalorder %v537_v45, %v152_v25 }
  0xb2   :  { %v174_v36 = vsel %vm165_vm7, %v551_v57, 0.0 }
  0xb3   :  { %v195_v38 = vsel %vm30_vm0, %v174_v36, 0.0 }
  0xb4   :  { %101 = vadd.xlane.f32.xlu1 %v100_v22  ;;  %98 = vadd.xlane.f32.xlu0 %v97_v23  ;;  %v155_v32 = vpop.permute.xlu1 %154 }
  0xb5   :  { %vm166_vm8 = vcmp.eq.s32.totalorder %v537_v45, %v155_v32 }
  0xb6   :  { %v175_v41 = vsel %vm166_vm8, %v547_v54, 0.0 }
  0xb7   :  { %v198_v42 = vsel %vm30_vm0, %v175_v41, 0.0 }
  0xb8   :  { %107 = vadd.xlane.f32.xlu1 %v106_v26  ;;  %104 = vadd.xlane.f32.xlu0 %v103_v27  ;;  %v158_v37 = vpop.permute.xlu1 %157 }
  0xb9   :  { %vm167_vm9 = vcmp.eq.s32.totalorder %v537_v45, %v158_v37 }
  0xba   :  { %v176_v44 = vsel %vm167_vm9, %v558_v0, 0.0 }
  0xbb   :  { %v201_v46 = vsel %vm30_vm0, %v176_v44, 0.0 }
  0xbc   :  { %190 = vadd.xlane.f32.xlu1 %v189_v30  ;;  %110 = vadd.xlane.f32.xlu0 %v109_v31 }
  0xc0   :  { %193 = vadd.xlane.f32.xlu1 %v192_v34  ;;  %226 = vadd.xlane.f32.xlu0 %v225_v35 }
  0xc4   :  { %196 = vadd.xlane.f32.xlu1 %v195_v38  ;;  %229 = vadd.xlane.f32.xlu0 %v228_v40 }
  0xc8   :  { %199 = vadd.xlane.f32.xlu1 %v198_v42  ;;  %232 = vadd.xlane.f32.xlu0 %v231_v43 }
  0xcc   :  { %202 = vadd.xlane.f32.xlu1 %v201_v46  ;;  %235 = vadd.xlane.f32.xlu0 %v234_v47 }
  0xd0   :  { %238 = vadd.xlane.f32.xlu0 %v237_v48 }
 0x119   :  { %v215_v50 = vpop.xlane.xlu1 %214 }
 0x11d   :  { %v218_v49 = vpop.xlane.xlu0 %217 }
 0x121   :  { %v600_v51 = vpop.xlane.xlu0 %220 }
 0x125   :  { %v224_v53 = vpop.xlane.xlu0 %223 }
 0x129   :  { %v179_v52 = vpop.xlane.xlu1 %178 }
 0x12d   :  { %v185_v55 = vpop.xlane.xlu1 %184 }
 0x131   :  { %v188_v56 = vpop.xlane.xlu1 %187  ;;  %v182_v57 = vpop.xlane.xlu0 %181 }
 0x135   :  { %v87_v58 = vpop.xlane.xlu1 %86  ;;  %v90_v59 = vpop.xlane.xlu0 %89 }
 0x136   :  { %404 = vlog2.f32 %v87_v58 }
 0x137   :  { %406 = vlog2.f32 %v90_v59 }
 0x139   :  { %v96_v54 = vpop.xlane.xlu1 %95  ;;  %v93_v60 = vpop.xlane.xlu0 %92 }
 0x13a   :  { %408 = vlog2.f32 %v96_v54 }
 0x13b   :  { %410 = vlog2.f32 %v93_v60 }
 0x13d   :  { %v102_v61 = vpop.xlane.xlu1 %101  ;;  %v99_v62 = vpop.xlane.xlu0 %98 }
 0x13e   :  { %412 = vlog2.f32 %v102_v61 }
 0x13f   :  { %414 = vlog2.f32 %v99_v62 }
 0x141   :  { %v108_v63 = vpop.xlane.xlu1 %107  ;;  %v105_v0 = vpop.xlane.xlu0 %104 }
 0x142   :  { %416 = vlog2.f32 %v108_v63 }
 0x143   :  { %v405_v1 = vpop.eup %404  ;;  %418 = vlog2.f32 %v105_v0 }
 0x144   :  { %v407_v2 = vpop.eup %406  ;;  %v113_v3 = vmul.f32 0.6931472, %v405_v1 }
 0x145   :  { %v115_v4 = vmul.f32 0.6931472, %v407_v2  ;;  %v191_v5 = vpop.xlane.xlu1 %190  ;;  %v111_v6 = vpop.xlane.xlu0 %110 }
 0x146   :  { %v204_v7 = vsub.f32 %v179_v52, %v113_v3  ;;  %v240_v8 = vmul.f32 40.0, %v113_v3  ;;  %420 = vlog2.f32 %v111_v6 }
 0x147   :  { %v409_v9 = vpop.eup %408  ;;  %v205_v10 = vsub.f32 %v182_v57, %v115_v4  ;;  %v241_v11 = vmul.f32 40.0, %v115_v4 }
 0x148   :  { %v411_v12 = vpop.eup %410  ;;  %v249_v13 = vsub.f32 %v215_v50, %v240_v8  ;;  %v119_v14 = vmul.f32 0.6931472, %v409_v9  ;;  %v258_v19 = vmul.f32 0.7948718, %v204_v7 }
 0x149   :  { %v250_v15 = vsub.f32 %v218_v49, %v241_v11  ;;  %v117_v16 = vmul.f32 0.6931472, %v411_v12  ;;  %v194_v17 = vpop.xlane.xlu1 %193  ;;  %v227_v18 = vpop.xlane.xlu0 %226  ;;  %v259_v24 = vmul.f32 0.7948718, %v205_v10 }
 0x14a   :  { %v267_v20 = vmul.f32 0.0051282053, %v249_v13  ;;  %v207_v21 = vsub.f32 %v188_v56, %v119_v14  ;;  %v243_v22 = vmul.f32 40.0, %v119_v14  ;;  %v296_v13 = vshrl.u32 %v130_v39, 7 }
 0x14b   :  { %v413_v23 = vpop.eup %412  ;;  %v268_v25 = vmul.f32 0.0051282053, %v250_v15  ;;  %v206_v26 = vsub.f32 %v185_v55, %v117_v16  ;;  %v242_v27 = vmul.f32 40.0, %v117_v16 }
 0x14c   :  { %v415_v28 = vpop.eup %414  ;;  %v276_v29 = vadd.f32 %v267_v20, %v258_v19  ;;  %v252_v30 = vsub.f32 %v224_v53, %v243_v22  ;;  %v261_v31 = vmul.f32 0.7948718, %v207_v21  ;;  %v123_v32 = vmul.f32 0.6931472, %v413_v23 }
 0x14d   :  { %v277_v33 = vadd.f32 %v268_v25, %v259_v24  ;;  %v251_v34 = vsub.f32 %v600_v51, %v242_v27  ;;  %v260_v35 = vmul.f32 0.7948718, %v206_v26  ;;  %v121_v36 = vmul.f32 0.6931472, %v415_v28  ;;  %v197_v37 = vpop.xlane.xlu1 %196  ;;  %v230_v38 = vpop.xlane.xlu0 %229 }
 0x14e   :  { %v285_v40 = vsub.f32 0.0, %v276_v29  ;;  %v270_v41 = vmul.f32 0.0051282053, %v252_v30  ;;  %v209_v42 = vsub.f32 %v194_v17, %v123_v32  ;;  %v245_v43 = vmul.f32 40.0, %v123_v32 }
 0x14f   :  { %v417_v44 = vpop.eup %416  ;;  %v286_v46 = vsub.f32 0.0, %v277_v33  ;;  %v269_v47 = vmul.f32 0.0051282053, %v251_v34  ;;  %v208_v48 = vsub.f32 %v191_v5, %v121_v36  ;;  %v244_v49 = vmul.f32 40.0, %v121_v36 }
 0x150   :  { %v419_v50 = vpop.eup %418  ;;  %v334_v52 = vsel %vm333_vm10, %v285_v40, 0.0  ;;  %v279_v53 = vadd.f32 %v270_v41, %v261_v31  ;;  %v263_v55 = vmul.f32 0.7948718, %v209_v42  ;;  %v254_v56 = vsub.f32 %v230_v38, %v245_v43 }
 0x151   :  { %v335_v51 = vsel %vm333_vm10, %v286_v46, 0.0  ;;  %v278_v57 = vadd.f32 %v269_v47, %v260_v35  ;;  %v262_v58 = vmul.f32 0.7948718, %v208_v48  ;;  %v253_v59 = vsub.f32 %v227_v18, %v244_v49  ;;  %v200_v54 = vpop.xlane.xlu1 %199  ;;  %v233_v60 = vpop.xlane.xlu0 %232 }
 0x152   :  { %v288_v61 = vsub.f32 0.0, %v279_v53  ;;  %v125_v62 = vmul.f32 0.6931472, %v419_v50  ;;  %v272_v63 = vmul.f32 0.0051282053, %v254_v56  ;;  %v336_v4 = vadd.f32 %v335_v51, %v334_v52 }
 0x153   :  { %v421_v0 = vpop.eup %420  ;;  %v287_v1 = vsub.f32 0.0, %v278_v57  ;;  %v271_v2 = vmul.f32 0.0051282053, %v253_v59  ;;  %v127_v3 = vmul.f32 0.6931472, %v417_v44  ;;  %v304_v34 = vadd.s32 64, %v296_v13 }
 0x154   :  { %v210_v5 = vsub.f32 %v197_v37, %v125_v62  ;;  %v281_v6 = vadd.f32 %v272_v63, %v263_v55  ;;  %v246_v7 = vmul.f32 40.0, %v125_v62  ;;  %v129_v11 = vmul.f32 0.6931472, %v421_v0 }
 0x155   :  { %v337_v8 = vsel %vm333_vm10, %v287_v1, 0.0  ;;  %v280_v9 = vadd.f32 %v271_v2, %v262_v58  ;;  %v203_v10 = vpop.xlane.xlu1 %202  ;;  %v236_v12 = vpop.xlane.xlu0 %235  ;;  %v339_v15 = vsel %vm333_vm10, %v288_v61, 0.0  ;;  %v211_v16 = vsub.f32 %v200_v54, %v127_v3 }
 0x156   :  { %v338_v14 = vadd.f32 %v337_v8, %v336_v4  ;;  %v255_v17 = vsub.f32 %v233_v60, %v246_v7  ;;  %v264_v19 = vmul.f32 0.7948718, %v210_v5  ;;  %v290_v20 = vsub.f32 0.0, %v281_v6 }
 0x157   :  { %v289_v18 = vsub.f32 0.0, %v280_v9  ;;  %v247_v21 = vmul.f32 40.0, %v127_v3  ;;  %v212_v24 = vsub.f32 %v203_v10, %v129_v11  ;;  %v248_v25 = vmul.f32 40.0, %v129_v11 }
 0x158   :  { %v340_v22 = vadd.f32 %v339_v15, %v338_v14  ;;  %v273_v23 = vmul.f32 0.0051282053, %v255_v17  ;;  %v343_v31 = vsel %vm333_vm10, %v290_v20, 0.0  ;;  %v265_v32 = vmul.f32 0.7948718, %v211_v16 }
 0x159   :  { %v341_v26 = vsel %vm333_vm10, %v289_v18, 0.0  ;;  %v256_v27 = vsub.f32 %v236_v12, %v247_v21  ;;  %v239_v28 = vpop.xlane.xlu0 %238  ;;  %v266_v37 = vmul.f32 0.7948718, %v212_v24  ;;  %vm323_vm11 = vcmp.lt.s32.totalorder %v304_v34, 70 }
 0x15a   :  { %v342_v29 = vadd.f32 %v341_v26, %v340_v22  ;;  %v282_v30 = vadd.f32 %v273_v23, %v264_v19  ;;  %v257_v39 = vsub.f32 %v239_v28, %v248_v25  ;;  %vm360_vm12 = vcmp.eq.s32.totalorder %v296_v13, 0 }
 0x15b   :  { %v274_v33 = vmul.f32 0.0051282053, %v256_v27  ;;  %vm362_vm14 = vmand %vm360_vm12, %vm361_vm13 }
 0x15c   :  { %v344_v35 = vadd.f32 %v343_v31, %v342_v29  ;;  %v291_v36 = vsub.f32 0.0, %v282_v30  ;;  %v275_v38 = vmul.f32 0.0051282053, %v257_v39 }
 0x15d   :  { %v283_v40 = vadd.f32 %v274_v33, %v265_v32 }
 0x15e   :  { %v345_v41 = vsel %vm333_vm10, %v291_v36, 0.0  ;;  %v284_v42 = vadd.f32 %v275_v38, %v266_v37 }
 0x15f   :  { %v292_v43 = vsub.f32 0.0, %v283_v40  ;;  %v346_v44 = vadd.f32 %v345_v41, %v344_v35 }
 0x160   :  { %v293_v46 = vsub.f32 0.0, %v284_v42 }
 0x161   :  { %v347_v47 = vsel %vm333_vm10, %v292_v43, 0.0 }
 0x162   :  { %v332_v48 = vsel %vm323_vm11, %v293_v46, 0.0  ;;  %v348_v49 = vadd.f32 %v347_v47, %v346_v44 }
 0x163   :  { %v349_v50 = vsel %vm333_vm10, %v332_v48, 0.0 }
 0x164   :  { %v350_v52 = vadd.f32 %v349_v50, %v348_v49 }
 0x166   :  { %351 = vadd.xlane.f32.xlu1 %v350_v52 }
 0x1ef   :  { %v352_v53 = vpop.xlane.xlu1 %351 }
 0x1f0   :  { %v353_v55 = vrot.slane %v352_v53, 4 }
 0x1f2   :  { %v354_v56 = vadd.f32 %v353_v55, %v352_v53 }
 0x1f4   :  { %v355_v51 = vrot.slane %v354_v56, 2 }
 0x1f6   :  { %v356_v57 = vadd.f32 %v355_v51, %v354_v56 }
 0x1f8   :  { %v357_v58 = vrot.slane %v356_v57, 1 }
 0x1fa   :  { %v358_v59 = vadd.f32 %v357_v58, %v356_v57 }
 0x1fc   :  { %380 = vpush %v358_v59 }
 0x22d   :  { %s381_s17 = spop %380 }
 0x22e   :  { %v363_v54 = vstv %s381_s17 }
 0x22f   :  { %v364_v60 = vsel %vm362_vm14, %v363_v54, 0.0 }
 0x230   :  { %365 = vst [vmem:[#allocation2] sm:$0xff] %v364_v60 }
 0x231   :  { %433 = shalt.err (!%p430_p4)
}
 0x232   :  { %375 = dma.vmem_to_hbm [thread:$0]  %s373_s16, 128, %s619_s2, [#allocation3]  }
 0x233   :  { %442 = dma.done.wait [#allocation3], 128  }
 0x234   :  { %443 = vsyncadd [#allocation3], 4294967168 }
 0x235   :  { %379 = vsyncpa [#allocation3], 1 }

</bundles_post_ra>
